<compile_context>
chip_gen: v5e
topology: v5e:2x2
jax: 0.10.0
libtpu: 0.0.40
codegen_flags: <defaults>
</compile_context>

<pallas_src>
import math
from functools import partial

import jax
import jax.numpy as jnp
from jax import lax
from jax.experimental import pallas as pl
from jax.experimental.pallas import tpu as pltpu

_BN_EPS = 1e-5  # nn.BatchNorm2d default


def _cdiv(a, b):
    return (a + b - 1) // b


def _round_up(x, m):
    return ((x + m - 1) // m) * m


def _hardswish(z):
    # nn.Hardswish: x * relu6(x + 3) / 6
    return z * jnp.clip(z + 3.0, 0.0, 6.0) * (1.0 / 6.0)


# ---------------------------------------------------------------------------
# Kernel 1: cv1 pointwise conv as a row-tiled MXU matmul + masked BN partials
# ---------------------------------------------------------------------------
def _conv1x1_stats_kernel(x_ref, w_ref, y_ref, s_ref, ss_ref, *,
                          total_rows, mxu_dtype):
    i = pl.program_id(0)
    tm = x_ref.shape[0]
    x = x_ref[...].astype(mxu_dtype)                                    # (TM, c1)
    y = jnp.dot(x, w_ref[...], preferred_element_type=jnp.float32)      # (TM, c_) f32

    # Tail mask: the last grid step may read garbage rows past R; they must not
    # contribute to the BN statistics (their stores are dropped automatically).
    row = i * tm + lax.broadcasted_iota(jnp.int32, (tm, 1), 0)
    yv = jnp.where(row < total_rows, y, 0.0)

    y_ref[...] = y.astype(y_ref.dtype)                                  # bf16 store
    s_ref[...] = jnp.sum(yv, axis=0).reshape(1, 1, -1)
    ss_ref[...] = jnp.sum(yv * yv, axis=0).reshape(1, 1, -1)


# ---------------------------------------------------------------------------
# Kernel 2: fused BN1 affine + Hardswish + in-VMEM zero halo + 3x3 conv
#           (im2col single dot OR 9 accumulating dots) + BN2 partial sums.
#           Spatially tiled: grid = (N, H // TH).  The 1-row top/bottom halos
#           arrive through two extra single-row BlockSpecs on the same tensor.
# ---------------------------------------------------------------------------
def _conv3x3_fused_kernel(body_ref, top_ref, bot_ref, scale_ref, bias_ref, w_ref,
                          y_ref, s_ref, ss_ref, *, n_th, use_im2col, mxu_dtype):
    f32 = jnp.float32
    t = pl.program_id(1)
    _, TH, W, c_ = body_ref.shape
    c2 = w_ref.shape[-1]

    scale = scale_ref[...].reshape(1, 1, c_)
    bias = bias_ref[...].reshape(1, 1, c_)

    def bn_act(v):
        z = v.astype(f32) * scale + bias
        return _hardswish(z)

    # The conv's zero padding applies to the *post-activation* map, so activate the
    # real rows first and then force the out-of-image halo rows to exactly zero.
    body_a = bn_act(body_ref[0])                                        # (TH, W, c_)
    top_a = bn_act(top_ref[0]) * (t > 0).astype(f32)                    # (1, W, c_)
    bot_a = bn_act(bot_ref[0]) * (t < n_th - 1).astype(f32)             # (1, W, c_)

    a = jnp.concatenate([top_a, body_a, bot_a], axis=0)                 # (TH+2, W, c_)
    zcol = jnp.zeros((TH + 2, 1, c_), f32)
    a = jnp.concatenate([zcol, a, zcol], axis=1)                        # (TH+2, W+2, c_)

    if use_im2col:
        # Lane-aligned channels: one big-K MXU dot against the combined weight.
        taps = [a[kh:kh + TH, kw:kw + W, :] for kh in range(3) for kw in range(3)]
        col = jnp.concatenate(taps, axis=-1).reshape(TH * W, 9 * c_)
        acc = jnp.dot(col.astype(mxu_dtype), w_ref[...].reshape(9 * c_, c2),
                      preferred_element_type=f32)
    else:
        # Small / unaligned c_: 9 accumulating dots, no 9x lane-concat slab.
        acc = jnp.zeros((TH * W, c2), f32)
        idx = 0
        for kh in range(3):
            for kw in range(3):
                tap = a[kh:kh + TH, kw:kw + W, :].reshape(TH * W, c_)
                acc = acc + jnp.dot(tap.astype(mxu_dtype), w_ref[idx],
                                    preferred_element_type=f32)
                idx += 1

    y_ref[...] = acc.reshape(1, TH, W, c2).astype(y_ref.dtype)          # bf16 store
    s_ref[...] = jnp.sum(acc, axis=0).reshape(1, 1, c2)
    ss_ref[...] = jnp.sum(acc * acc, axis=0).reshape(1, 1, c2)


# ---------------------------------------------------------------------------
# Kernel 3: fused BN2 affine + Hardswish (+ shortcut add), row-tiled
# ---------------------------------------------------------------------------
def _bn_hswish_add_kernel(y_ref, x_ref, scale_ref, bias_ref, o_ref):
    z = y_ref[...].astype(jnp.float32) * scale_ref[...] + bias_ref[...]
    o_ref[...] = (_hardswish(z) + x_ref[...].astype(jnp.float32)).astype(o_ref.dtype)


def _bn_hswish_kernel(y_ref, scale_ref, bias_ref, o_ref):
    z = y_ref[...].astype(jnp.float32) * scale_ref[...] + bias_ref[...]
    o_ref[...] = _hardswish(z).astype(o_ref.dtype)


# ---------------------------------------------------------------------------
# Wrapper
# ---------------------------------------------------------------------------
def _finalize_bn(psum, psumsq, gamma, beta, count):
    """Reduce per-tile partial sums -> BN scale/bias (training-mode batch stats)."""
    total = jnp.sum(psum, axis=0).reshape(-1)
    total_sq = jnp.sum(psumsq, axis=0).reshape(-1)
    mean = total / count
    var = jnp.maximum(total_sq / count - mean * mean, 0.0)   # biased var, f32 accums
    scale = gamma * lax.rsqrt(var + _BN_EPS)
    bias = beta - mean * scale
    return scale, bias


def _pick_spatial_tile(H, W, c_, c2, store_bytes, budget_bytes=16 * 2**20):
    """Largest divisor TH of H whose stage-2 VMEM working set fits the budget."""
    use_im2col = (c_ % 128 == 0)
    best = 1
    for th in range(1, H + 1):
        if H % th:
            continue
        ws = (2 * th * W * c_ * store_bytes          # body block (double-buffered)
              + 4 * W * c_ * store_bytes             # halo rows (double-buffered)
              + 2 * th * W * c2 * store_bytes        # output block (double-buffered)
              + (th + 2) * (W + 2) * c_ * 4          # padded f32 activation
              + 2 * th * W * c2 * 4                  # f32 accumulator + slack
              + 2 * 9 * c_ * c2 * store_bytes)       # weights (double-buffered)
        if use_im2col:
            ws += th * W * 9 * c_ * store_bytes      # im2col slab
        if ws <= budget_bytes:
            best = th
    return best


def bottleneck_forward(x_nchw, params, *, shortcut=True, row_tile=1024,
                       spatial_tile=None, mxu_dtype=jnp.bfloat16):
    """Pallas implementation of Bottleneck.forward (NCHW in / NCHW out)."""
    N, c1, H, W = x_nchw.shape
    w1 = params["cv1_w"]            # (c1, c_)
    w2 = params["cv2_w"]            # (3, 3, c_, c2)
    c_ = w1.shape[1]
    c2 = w2.shape[3]
    add = bool(shortcut) and (c1 == c2)
    # TODO(synk): grouped 3x3 conv (g > 1) not implemented; module default g=1 is.

    f32 = jnp.float32
    store_dt = jnp.bfloat16 if mxu_dtype == jnp.bfloat16 else f32
    store_bytes = 2 if store_dt == jnp.bfloat16 else 4

    # TODO(synk): keep NHWC end-to-end across blocks to drop these transposes.
    x_nhwc = jnp.transpose(x_nchw, (0, 2, 3, 1)).astype(f32)
    R = N * H * W
    x2d = x_nhwc.reshape(R, c1)

    TM = min(_round_up(row_tile, 8), _round_up(R, 8))
    nt1 = _cdiv(R, TM)
    parallel1 = pltpu.CompilerParams(dimension_semantics=("parallel",))

    # ---- stage 1: cv1 1x1 conv (bf16 MXU) + BN1 partial stats, row-tiled --------
    y1_flat, s1, ss1 = pl.pallas_call(
        partial(_conv1x1_stats_kernel, total_rows=R, mxu_dtype=mxu_dtype),
        grid=(nt1,),
        in_specs=[
            pl.BlockSpec((TM, c1), lambda i: (i, 0)),
            pl.BlockSpec((c1, c_), lambda i: (0, 0)),
        ],
        out_specs=[
            pl.BlockSpec((TM, c_), lambda i: (i, 0)),
            pl.BlockSpec((1, 1, c_), lambda i: (i, 0, 0)),
            pl.BlockSpec((1, 1, c_), lambda i: (i, 0, 0)),
        ],
        out_shape=[
            jax.ShapeDtypeStruct((R, c_), store_dt),
            jax.ShapeDtypeStruct((nt1, 1, c_), f32),
            jax.ShapeDtypeStruct((nt1, 1, c_), f32),
        ],
        compiler_params=parallel1,
    )(x2d, w1.astype(mxu_dtype))

    scale1, bias1 = _finalize_bn(s1, ss1,
                                 params["cv1_bn_gamma"].astype(f32),
                                 params["cv1_bn_beta"].astype(f32), float(R))

    # ---- stage 2: spatially tiled fused BN1+Hardswish+halo + 3x3 conv + BN2 stats
    if spatial_tile is not None:
        assert H % spatial_tile == 0, "spatial_tile must divide H"
        TH = int(spatial_tile)
    else:
        TH = _pick_spatial_tile(H, W, c_, c2, store_bytes)
    n_th = H // TH
    use_im2col = (c_ % 128 == 0)

    y1 = y1_flat.reshape(N, H, W, c_)              # free (contiguous) reshape
    w2_k = w2.astype(mxu_dtype).reshape(9, c_, c2)

    y2, s2, ss2 = pl.pallas_call(
        partial(_conv3x3_fused_kernel, n_th=n_th, use_im2col=use_im2col,
                mxu_dtype=mxu_dtype),
        grid=(N, n_th),
        in_specs=[
            # body rows of the tile
            pl.BlockSpec((1, TH, W, c_), lambda n, t: (n, t, 0, 0)),
            # 1-row top halo (clamped at the image top; zeroed in-kernel when t==0)
            pl.BlockSpec((1, 1, W, c_),
                         lambda n, t: (n, jnp.maximum(t * TH - 1, 0), 0, 0)),
            # 1-row bottom halo (clamped at the image bottom; zeroed when t==last)
            pl.BlockSpec((1, 1, W, c_),
                         lambda n, t: (n, jnp.minimum(t * TH + TH, H - 1), 0, 0)),
            pl.BlockSpec((1, c_), lambda n, t: (0, 0)),
            pl.BlockSpec((1, c_), lambda n, t: (0, 0)),
            pl.BlockSpec((9, c_, c2), lambda n, t: (0, 0, 0)),
        ],
        out_specs=[
            pl.BlockSpec((1, TH, W, c2), lambda n, t: (n, t, 0, 0)),
            pl.BlockSpec((1, 1, c2), lambda n, t: (n * n_th + t, 0, 0)),
            pl.BlockSpec((1, 1, c2), lambda n, t: (n * n_th + t, 0, 0)),
        ],
        out_shape=[
            jax.ShapeDtypeStruct((N, H, W, c2), store_dt),
            jax.ShapeDtypeStruct((N * n_th, 1, c2), f32),
            jax.ShapeDtypeStruct((N * n_th, 1, c2), f32),
        ],
        compiler_params=pltpu.CompilerParams(
            dimension_semantics=("parallel", "parallel"),
            vmem_limit_bytes=40 * 2**20),
    )(y1, y1, y1, scale1.reshape(1, c_), bias1.reshape(1, c_), w2_k)

    scale2, bias2 = _finalize_bn(s2, ss2,
                                 params["cv2_bn_gamma"].astype(f32),
                                 params["cv2_bn_beta"].astype(f32), float(R))

    # ---- stage 3: fused BN2 affine + Hardswish (+ shortcut), row-tiled -----------
    y2_flat = y2.reshape(R, c2)                    # free (contiguous) reshape
    nt3 = _cdiv(R, TM)
    scale2_2d = scale2.reshape(1, c2)
    bias2_2d = bias2.reshape(1, c2)

    if add:
        out2d = pl.pallas_call(
            _bn_hswish_add_kernel,
            grid=(nt3,),
            in_specs=[
                pl.BlockSpec((TM, c2), lambda i: (i, 0)),
                pl.BlockSpec((TM, c1), lambda i: (i, 0)),
                pl.BlockSpec((1, c2), lambda i: (0, 0)),
                pl.BlockSpec((1, c2), lambda i: (0, 0)),
            ],
            out_specs=pl.BlockSpec((TM, c2), lambda i: (i, 0)),
            out_shape=jax.ShapeDtypeStruct((R, c2), f32),
            compiler_params=parallel1,
        )(y2_flat, x2d, scale2_2d, bias2_2d)
    else:
        out2d = pl.pallas_call(
            _bn_hswish_kernel,
            grid=(nt3,),
            in_specs=[
                pl.BlockSpec((TM, c2), lambda i: (i, 0)),
                pl.BlockSpec((1, c2), lambda i: (0, 0)),
                pl.BlockSpec((1, c2), lambda i: (0, 0)),
            ],
            out_specs=pl.BlockSpec((TM, c2), lambda i: (i, 0)),
            out_shape=jax.ShapeDtypeStruct((R, c2), f32),
            compiler_params=parallel1,
        )(y2_flat, scale2_2d, bias2_2d)

    out = out2d.reshape(N, H, W, c2)
    return jnp.transpose(out, (0, 3, 1, 2)).astype(x_nchw.dtype)


# ---------------------------------------------------------------------------
# Params / reference / self-test
# ---------------------------------------------------------------------------
def init_params(key, c1, c2, e=0.5):
    """Deterministic init mimicking nn.Conv2d kaiming-uniform bounds."""
    c_ = int(c2 * e)
    k1, k2 = jax.random.split(key)
    b1 = 1.0 / math.sqrt(c1)                 # cv1 fan_in = c1*1*1
    w1 = jax.random.uniform(k1, (c1, c_), jnp.float32, -b1, b1)
    b2 = 1.0 / math.sqrt(9.0 * c_)           # cv2 fan_in = c_*3*3
    w2 = jax.random.uniform(k2, (3, 3, c_, c2), jnp.float32, -b2, b2)
    return {
        "cv1_w": w1,
        "cv1_bn_gamma": jnp.ones((c_,), jnp.float32),
        "cv1_bn_beta": jnp.zeros((c_,), jnp.float32),
        "cv2_w": w2,
        "cv2_bn_gamma": jnp.ones((c2,), jnp.float32),
        "cv2_bn_beta": jnp.zeros((c2,), jnp.float32),
    }


def _bn_hswish_ref(y, gamma, beta):
    mean = jnp.mean(y, axis=(0, 2, 3), keepdims=True)
    var = jnp.mean((y - mean) ** 2, axis=(0, 2, 3), keepdims=True)
    y = (y - mean) * lax.rsqrt(var + _BN_EPS)
    y = y * gamma[None, :, None, None] + beta[None, :, None, None]
    return y * jnp.clip(y + 3.0, 0.0, 6.0) * (1.0 / 6.0)


def _reference(x, params, shortcut=True):
    """Plain-JAX (lax conv) mirror of the PyTorch Bottleneck.forward."""
    c1 = x.shape[1]
    c2 = params["cv2_w"].shape[3]
    w1 = jnp.transpose(params["cv1_w"], (1, 0))[:, :, None, None]   # (c_, c1, 1, 1)
    y = lax.conv_general_dilated(x, w1, (1, 1), ((0, 0), (0, 0)),
                                 dimension_numbers=("NCHW", "OIHW", "NCHW"))
    y = _bn_hswish_ref(y, params["cv1_bn_gamma"], params["cv1_bn_beta"])
    w2 = jnp.transpose(params["cv2_w"], (3, 2, 0, 1))               # (c2, c_, 3, 3)
    y = lax.conv_general_dilated(y, w2, (1, 1), ((1, 1), (1, 1)),
                                 dimension_numbers=("NCHW", "OIHW", "NCHW"))
    y = _bn_hswish_ref(y, params["cv2_bn_gamma"], params["cv2_bn_beta"])
    if shortcut and c1 == c2:
        y = y + x
    return y


if __name__ == "__main__":
    key = jax.random.PRNGKey(0)
    k_x, k_p = jax.random.split(key)

    N, C, H, W = 2, 4, 16, 16
    x = jax.random.normal(k_x, (N, C, H, W), jnp.float32)
    params = init_params(k_p, c1=C, c2=C, e=0.5)

    ref = jax.block_until_ready(_reference(x, params, shortcut=True))

    # 1) Default perf config: bf16 MXU operands + bf16 intermediates.
    out_bf16 = jax.block_until_ready(bottleneck_forward(x, params, shortcut=True))
    assert out_bf16.shape == (N, C, H, W)
    err = jnp.abs(out_bf16 - ref)
    max_e, mean_e = float(jnp.max(err)), float(jnp.mean(err))
    assert max_e < 0.25 and mean_e < 0.03, \
        f"bf16 path mismatch vs reference: max {max_e}, mean {mean_e}"

    # 2) f32 config with small tiles: exercises row-tail masking and the
    #    multi-row-tile halo logic; tight tolerance vs the f32 reference.
    out_f32 = jax.block_until_ready(
        bottleneck_forward(x, params, shortcut=True, row_tile=192,
                           spatial_tile=4, mxu_dtype=jnp.float32))
    err32 = float(jnp.max(jnp.abs(out_f32 - ref)))
    assert jnp.allclose(out_f32, ref, atol=2e-3, rtol=2e-3), \
        f"f32 path mismatch vs reference: max abs err {err32}"

    # 3) No-shortcut branch.
    ref_ns = jax.block_until_ready(_reference(x, params, shortcut=False))
    out_ns = jax.block_until_ready(
        bottleneck_forward(x, params, shortcut=False, row_tile=192,
                           spatial_tile=8, mxu_dtype=jnp.float32))
    assert jnp.allclose(out_ns, ref_ns, atol=2e-3, rtol=2e-3), "no-shortcut mismatch"

    print("KERNEL_OK")
</pallas_src>

<mosaic_0001>
module attributes {stable_mosaic.version = 11 : i64} {
  func.func @_conv1x1_stats_kernel(%arg0: i32, %arg1: memref<512x4xf32, #tpu.memory_space<vmem>>, %arg2: memref<4x2xbf16, #tpu.memory_space<vmem>>, %arg3: memref<512x2xbf16, #tpu.memory_space<vmem>>, %arg4: memref<1x1x2xf32, #tpu.memory_space<vmem>>, %arg5: memref<1x1x2xf32, #tpu.memory_space<vmem>>) attributes {dimension_semantics = [#tpu.dimension_semantics<parallel>], iteration_bounds = array<i64: 1>, scalar_prefetch = 0 : i64, scratch_operands = 0 : i64, tpu.core_type = #tpu.core_type<tc>, window_params = [{transform_indices = @transform_0, window_bounds = array<i64: 512, 4>}, {pipeline_mode = #tpu.pipeline_mode<synchronous>, transform_indices = @transform_1, window_bounds = array<i64: 4, 2>}, {transform_indices = @transform_2, window_bounds = array<i64: 512, 2>}, {transform_indices = @transform_3, window_bounds = array<i64: 1, 1, 2>}, {transform_indices = @transform_4, window_bounds = array<i64: 1, 1, 2>}]} {
    %c0 = arith.constant 0 : index
    %c0_0 = arith.constant 0 : index
    %0 = vector.load %arg1[%c0, %c0_0] : memref<512x4xf32, #tpu.memory_space<vmem>>, vector<512x4xf32>
    %1 = arith.truncf %0 : vector<512x4xf32> to vector<512x4xbf16>
    %c0_1 = arith.constant 0 : index
    %c0_2 = arith.constant 0 : index
    %2 = vector.load %arg2[%c0_1, %c0_2] : memref<4x2xbf16, #tpu.memory_space<vmem>>, vector<4x2xbf16>
    %cst = arith.constant dense<0.000000e+00> : vector<512x2xf32>
    %3 = tpu.matmul %1, %2, %cst {dimension_numbers = #tpu.dot_dimension_numbers<[1], [0], [0], [1], [0, 0, 1, 1], [], []>} : vector<512x4xbf16>, vector<4x2xbf16>, vector<512x2xf32> -> vector<512x2xf32>
    %c512_i32 = arith.constant 512 : i32
    %4 = arith.muli %arg0, %c512_i32 : i32
    %5 = tpu.iota {dimensions = array<i32: 0>} : vector<512x1xi32>
    %6 = vector.broadcast %4 : i32 to vector<512x1xi32>
    %7 = arith.addi %6, %5 : vector<512x1xi32>
    %c512_i32_3 = arith.constant 512 : i32
    %8 = vector.broadcast %c512_i32_3 : i32 to vector<512x1xi32>
    %9 = arith.cmpi slt, %7, %8 : vector<512x1xi32>
    %cst_4 = arith.constant 0.000000e+00 : f32
    %10 = vector.shape_cast %9 : vector<512x1xi1> to vector<512x1xi1>
    %11 = vector.broadcast %10 : vector<512x1xi1> to vector<512x2xi1>
    %12 = vector.broadcast %cst_4 : f32 to vector<512x2xf32>
    %13 = arith.select %11, %3, %12 : vector<512x2xi1>, vector<512x2xf32>
    %14 = arith.truncf %3 : vector<512x2xf32> to vector<512x2xbf16>
    %c0_5 = arith.constant 0 : index
    %c0_6 = arith.constant 0 : index
    %15 = vector.load %arg3[%c0_5, %c0_6] : memref<512x2xbf16, #tpu.memory_space<vmem>>, vector<512x2xbf16>
    tpu.vector_store %arg3[%c0_5, %c0_6], %14 {strides = array<i32>} : memref<512x2xbf16, #tpu.memory_space<vmem>>, vector<512x2xbf16>,
    %cst_7 = arith.constant dense<0.000000e+00> : vector<2xf32>
    %16 = vector.multi_reduction <add>, %13, %cst_7 [0] : vector<512x2xf32> to vector<2xf32>
    %17 = vector.shape_cast %16 : vector<2xf32> to vector<1x1x2xf32>
    %c0_8 = arith.constant 0 : index
    %c0_9 = arith.constant 0 : index
    %c0_10 = arith.constant 0 : index
    %18 = vector.load %arg4[%c0_8, %c0_9, %c0_10] : memref<1x1x2xf32, #tpu.memory_space<vmem>>, vector<1x1x2xf32>
    tpu.vector_store %arg4[%c0_8, %c0_9, %c0_10], %17 {strides = array<i32>} : memref<1x1x2xf32, #tpu.memory_space<vmem>>, vector<1x1x2xf32>,
    %19 = arith.mulf %13, %13 : vector<512x2xf32>
    %cst_11 = arith.constant dense<0.000000e+00> : vector<2xf32>
    %20 = vector.multi_reduction <add>, %19, %cst_11 [0] : vector<512x2xf32> to vector<2xf32>
    %21 = vector.shape_cast %20 : vector<2xf32> to vector<1x1x2xf32>
    %c0_12 = arith.constant 0 : index
    %c0_13 = arith.constant 0 : index
    %c0_14 = arith.constant 0 : index
    %22 = vector.load %arg5[%c0_12, %c0_13, %c0_14] : memref<1x1x2xf32, #tpu.memory_space<vmem>>, vector<1x1x2xf32>
    tpu.vector_store %arg5[%c0_12, %c0_13, %c0_14], %21 {strides = array<i32>} : memref<1x1x2xf32, #tpu.memory_space<vmem>>, vector<1x1x2xf32>,
    return
  }
  func.func @transform_0(%arg0: i32) -> (i32, i32) {
    %c0_i32 = arith.constant 0 : i32
    %c0_i32_0 = arith.constant 0 : i32
    return %arg0, %c0_i32 : i32, i32
  }
  func.func @transform_1(%arg0: i32) -> (i32, i32) {
    %c0_i32 = arith.constant 0 : i32
    %c0_i32_0 = arith.constant 0 : i32
    %c0_i32_1 = arith.constant 0 : i32
    return %c0_i32, %c0_i32_0 : i32, i32
  }
  func.func @transform_2(%arg0: i32) -> (i32, i32) {
    %c0_i32 = arith.constant 0 : i32
    %c0_i32_0 = arith.constant 0 : i32
    return %arg0, %c0_i32 : i32, i32
  }
  func.func @transform_3(%arg0: i32) -> (i32, i32, i32) {
    %c0_i32 = arith.constant 0 : i32
    %c0_i32_0 = arith.constant 0 : i32
    %c0_i32_1 = arith.constant 0 : i32
    return %arg0, %c0_i32, %c0_i32_0 : i32, i32, i32
  }
  func.func @transform_4(%arg0: i32) -> (i32, i32, i32) {
    %c0_i32 = arith.constant 0 : i32
    %c0_i32_0 = arith.constant 0 : i32
    %c0_i32_1 = arith.constant 0 : i32
    return %arg0, %c0_i32, %c0_i32_0 : i32, i32, i32
  }
}

</mosaic_0001>

<bundles_post_ra>
// kernel: tpu_custom_call.1
= control target key start
LH: loop header
LB: loop body
LE: loop exit
PB: predicated region body
PF: predicated region fallthrough
CT: control target
= control target key end

     0   :  { %10 = vsyncpa [#allocation3], 0  ;;  %vm211_vm0 = vcmask 1041408   ;;  %vm114_vm1 = vcmask 31744   ;;  %s2387_s0 = inlined_call_operand.vmem [shape: f32[512,4], index: 0, kind: input, shape index: {}]   ;;  %s2388_s1 = inlined_call_operand.vmem [shape: bf16[4,2], index: 1, kind: input, shape index: {}]   ;;  %s2389_s2 = inlined_call_operand.vmem [shape: bf16[512,2], index: 2, kind: output, shape index: {0}]   ;;  %s2390_s3 = inlined_call_operand.hbm [shape: f32[1,1,2], index: 3, kind: output, shape index: {1}]   ;;  %s2391_s4 = inlined_call_operand.hbm [shape: f32[1,1,2], index: 4, kind: output, shape index: {2}]  }
   0x1   :  { %v113_v0 = vld [vmem:[%s2388_s1] sm:$0x3]  ;;  %v18_v2 = vld [vmem:[%s2387_s0 + $0x8] sm:$0xff] }
   0x2   :  { %v17_v1 = vld [vmem:[%s2387_s0] sm:$0xff]  ;;  %v213_v3 = vsel %vm211_vm0, %v113_v0, 0  ;;  %v34_v6 = vld [vmem:[%s2387_s0 + $0x88] sm:$0xff] }
   0x3   :  { %v81_v4 = vpack.c.bf16 %v18_v2, %v17_v1  ;;  %v33_v5 = vld [vmem:[%s2387_s0 + $0x80] sm:$0xff]  ;;  %222 = vmatpush.bf16.msra.mxu0 %v213_v3  ;;  %1302 = vmatpush.bf16.msra.mxu1 %v213_v3 }
   0x4   :  { %v89_v7 = vpack.c.bf16 %v34_v6, %v33_v5  ;;  %1303 = vmatpush.bf16.msra.mxu2 %v213_v3  ;;  %1304 = vmatpush.bf16.msra.mxu3 %v213_v3 }
   0x5   :  { %11 = vsyncpa [#allocation5], 0  ;;  %v19_v8 = vld [vmem:[%s2387_s0 + $0x10] sm:$0xff]  ;;  %v20_v9 = vld [vmem:[%s2387_s0 + $0x18] sm:$0xff]  ;;  %vm835_vm2 = vcmask 11264   ;;  %vm900_vm3 = vcmask 15360  }
   0x6   :  { %1270 = vmatmul.msk.bf16.vlgmr.msra.gmra.mxu0 %vm114_vm1, %v81_v4  ;;  %1278 = vmatmul.msk.bf16.vlgmr.msra.gmra.mxu1 %vm114_vm1, %v89_v7  ;;  %v35_v10 = vld [vmem:[%s2387_s0 + $0x90] sm:$0xff]  ;;  %v36_v11 = vld [vmem:[%s2387_s0 + $0x98] sm:$0xff]  ;;  %v82_v12 = vpack.c.bf16 %v20_v9, %v19_v8  ;;  %v49_v14 = vld [vmem:[%s2387_s0 + $0x100] sm:$0xff]  ;;  %s1243_s28 = sshll.u32 %s2390_s3, 4  ;;  %vm1034_vm4 = vcmask 8192   ;;  %s1360_s29 = smov [#allocation4]   ;;  %s1244_s28 = int_to_ptr.hbm [resolvable:$true] %s1243_s28 }
   0x7   :  { %v90_v13 = vpack.c.bf16 %v36_v11, %v35_v10  ;;  %v50_v15 = vld [vmem:[%s2387_s0 + $0x108] sm:$0xff]  ;;  %v21_v17 = vld [vmem:[%s2387_s0 + $0x20] sm:$0xff]  ;;  %v51_v23 = vld [vmem:[%s2387_s0 + $0x110] sm:$0xff]  ;;  %s1252_s30 = sshll.u32 %s1360_s29, 4  ;;  %s1253_s30 = int_to_ptr.vmem [resolvable:$true] %s1252_s30 }
   0x8   :  { %v97_v16 = vpack.c.bf16 %v50_v15, %v49_v14  ;;  %v22_v18 = vld [vmem:[%s2387_s0 + $0x28] sm:$0xff]  ;;  %v37_v19 = vld [vmem:[%s2387_s0 + $0xa0] sm:$0xff]  ;;  %v52_v24 = vld [vmem:[%s2387_s0 + $0x118] sm:$0xff] }
   0x9   :  { %v38_v20 = vld [vmem:[%s2387_s0 + $0xa8] sm:$0xff]  ;;  %v83_v21 = vpack.c.bf16 %v22_v18, %v21_v17  ;;  %v98_v25 = vpack.c.bf16 %v52_v24, %v51_v23  ;;  %v23_v26 = vld [vmem:[%s2387_s0 + $0x30] sm:$0xff]  ;;  %v24_v27 = vld [vmem:[%s2387_s0 + $0x38] sm:$0xff] }
   0xa   :  { %1286 = vmatmul.msk.bf16.vlgmr.msra.gmra.mxu2 %vm114_vm1, %v97_v16  ;;  %v91_v22 = vpack.c.bf16 %v38_v20, %v37_v19  ;;  %v39_v28 = vld [vmem:[%s2387_s0 + $0xb0] sm:$0xff]  ;;  %v40_v29 = vld [vmem:[%s2387_s0 + $0xb8] sm:$0xff]  ;;  %v84_v30 = vpack.c.bf16 %v24_v27, %v23_v26  ;;  %v53_v32 = vld [vmem:[%s2387_s0 + $0x120] sm:$0xff] }
   0xb   :  { %v92_v31 = vpack.c.bf16 %v40_v29, %v39_v28  ;;  %v54_v33 = vld [vmem:[%s2387_s0 + $0x128] sm:$0xff]  ;;  %v65_v34 = vld [vmem:[%s2387_s0 + $0x180] sm:$0xff]  ;;  %v55_v44 = vld [vmem:[%s2387_s0 + $0x130] sm:$0xff] }
   0xc   :  { %v99_v35 = vpack.c.bf16 %v54_v33, %v53_v32  ;;  %v66_v36 = vld [vmem:[%s2387_s0 + $0x188] sm:$0xff]  ;;  %v25_v38 = vld [vmem:[%s2387_s0 + $0x40] sm:$0xff]  ;;  %v56_v45 = vld [vmem:[%s2387_s0 + $0x138] sm:$0xff] }
   0xd   :  { %v105_v37 = vpack.c.bf16 %v66_v36, %v65_v34  ;;  %v26_v39 = vld [vmem:[%s2387_s0 + $0x48] sm:$0xff]  ;;  %v41_v40 = vld [vmem:[%s2387_s0 + $0xc0] sm:$0xff]  ;;  %v67_v46 = vld [vmem:[%s2387_s0 + $0x190] sm:$0xff]  ;;  %v100_v47 = vpack.c.bf16 %v56_v45, %v55_v44 }
   0xe   :  { %v42_v41 = vld [vmem:[%s2387_s0 + $0xc8] sm:$0xff]  ;;  %v85_v42 = vpack.c.bf16 %v26_v39, %v25_v38  ;;  %v68_v48 = vld [vmem:[%s2387_s0 + $0x198] sm:$0xff]  ;;  %v27_v50 = vld [vmem:[%s2387_s0 + $0x50] sm:$0xff] }
   0xf   :  { %1294 = vmatmul.msk.bf16.vlgmr.msra.gmra.mxu3 %vm114_vm1, %v105_v37  ;;  %v93_v43 = vpack.c.bf16 %v42_v41, %v41_v40  ;;  %v106_v49 = vpack.c.bf16 %v68_v48, %v67_v46  ;;  %v28_v51 = vld [vmem:[%s2387_s0 + $0x58] sm:$0xff]  ;;  %v43_v52 = vld [vmem:[%s2387_s0 + $0xd0] sm:$0xff]  ;;  %v57_v56 = vld [vmem:[%s2387_s0 + $0x140] sm:$0xff] }
  0x10   :  { %v44_v53 = vld [vmem:[%s2387_s0 + $0xd8] sm:$0xff]  ;;  %v86_v54 = vpack.c.bf16 %v28_v51, %v27_v50  ;;  %v58_v57 = vld [vmem:[%s2387_s0 + $0x148] sm:$0xff]  ;;  %v69_v58 = vld [vmem:[%s2387_s0 + $0x1a0] sm:$0xff] }
  0x11   :  { %v94_v55 = vpack.c.bf16 %v44_v53, %v43_v52  ;;  %v101_v59 = vpack.c.bf16 %v58_v57, %v57_v56  ;;  %v70_v60 = vld [vmem:[%s2387_s0 + $0x1a8] sm:$0xff]  ;;  %v29_v62 = vld [vmem:[%s2387_s0 + $0x60] sm:$0xff]  ;;  %v59_v4 = vld [vmem:[%s2387_s0 + $0x150] sm:$0xff] }
  0x12   :  { %v107_v61 = vpack.c.bf16 %v70_v60, %v69_v58  ;;  %v30_v63 = vld [vmem:[%s2387_s0 + $0x68] sm:$0xff]  ;;  %v45_v0 = vld [vmem:[%s2387_s0 + $0xe0] sm:$0xff]  ;;  %v60_v5 = vld [vmem:[%s2387_s0 + $0x158] sm:$0xff] }
  0x13   :  { %v46_v1 = vld [vmem:[%s2387_s0 + $0xe8] sm:$0xff]  ;;  %v87_v2 = vpack.c.bf16 %v30_v63, %v29_v62  ;;  %v71_v6 = vld [vmem:[%s2387_s0 + $0x1b0] sm:$0xff]  ;;  %v102_v7 = vpack.c.bf16 %v60_v5, %v59_v4  ;;  %v72_v8 = vld [vmem:[%s2387_s0 + $0x1b8] sm:$0xff] }
  0x14   :  { %v95_v3 = vpack.c.bf16 %v46_v1, %v45_v0  ;;  %v108_v9 = vpack.c.bf16 %v72_v8, %v71_v6  ;;  %v31_v10 = vld [vmem:[%s2387_s0 + $0x70] sm:$0xff]  ;;  %v32_v11 = vld [vmem:[%s2387_s0 + $0x78] sm:$0xff]  ;;  %v61_v16 = vld [vmem:[%s2387_s0 + $0x160] sm:$0xff] }
  0x15   :  { %v88_v14 = vpack.c.bf16 %v32_v11, %v31_v10  ;;  %v62_v17 = vld [vmem:[%s2387_s0 + $0x168] sm:$0xff]  ;;  %v73_v18 = vld [vmem:[%s2387_s0 + $0x1c0] sm:$0xff]  ;;  %v63_v26 = vld [vmem:[%s2387_s0 + $0x170] sm:$0xff] }
  0x16   :  { %1271 = vmatmul.msk.bf16.gmra.mxu0 %vm114_vm1, %v82_v12  ;;  %1279 = vmatmul.msk.bf16.gmra.mxu1 %vm114_vm1, %v90_v13  ;;  %v47_v12 = vld [vmem:[%s2387_s0 + $0xf0] sm:$0xff]  ;;  %v48_v13 = vld [vmem:[%s2387_s0 + $0xf8] sm:$0xff]  ;;  %v103_v19 = vpack.c.bf16 %v62_v17, %v61_v16  ;;  %v74_v20 = vld [vmem:[%s2387_s0 + $0x1c8] sm:$0xff] }
  0x17   :  { %v96_v15 = vpack.c.bf16 %v48_v13, %v47_v12  ;;  %v64_v27 = vld [vmem:[%s2387_s0 + $0x178] sm:$0xff]  ;;  %v75_v28 = vld [vmem:[%s2387_s0 + $0x1d0] sm:$0xff]  ;;  %v77_v51 = vld [vmem:[%s2387_s0 + $0x1e0] sm:$0xff] }
  0x18   :  { %v104_v29 = vpack.c.bf16 %v64_v27, %v63_v26  ;;  %v78_v52 = vld [vmem:[%s2387_s0 + $0x1e8] sm:$0xff]  ;;  %v79_v12 = vld [vmem:[%s2387_s0 + $0x1f0] sm:$0xff]  ;;  %v80_v13 = vld [vmem:[%s2387_s0 + $0x1f8] sm:$0xff] }
  0x1a   :  { %1287 = vmatmul.msk.bf16.gmra.mxu2 %vm114_vm1, %v98_v25 }
  0x1f   :  { %1295 = vmatmul.msk.bf16.gmra.mxu3 %vm114_vm1, %v106_v49 }
  0x26   :  { %1272 = vmatmul.msk.bf16.gmra.mxu0 %vm114_vm1, %v83_v21  ;;  %1280 = vmatmul.msk.bf16.gmra.mxu1 %vm114_vm1, %v91_v22  ;;  %v109_v21 = vpack.c.bf16 %v74_v20, %v73_v18 }
  0x2a   :  { %1288 = vmatmul.msk.bf16.gmra.mxu2 %vm114_vm1, %v99_v35 }
  0x2f   :  { %1296 = vmatmul.msk.bf16.gmra.mxu3 %vm114_vm1, %v107_v61 }
  0x36   :  { %1273 = vmatmul.msk.bf16.gmra.mxu0 %vm114_vm1, %v84_v30  ;;  %1281 = vmatmul.msk.bf16.gmra.mxu1 %vm114_vm1, %v92_v31  ;;  %v76_v30 = vld [vmem:[%s2387_s0 + $0x1d8] sm:$0xff]  ;;  %s1254_s0 = sshll.u32 %s2391_s4, 4  ;;  %s1255_s0 = int_to_ptr.hbm [resolvable:$true] %s1254_s0 }
  0x37   :  { %v110_v31 = vpack.c.bf16 %v76_v30, %v75_v28 }
  0x3a   :  { %1289 = vmatmul.msk.bf16.gmra.mxu2 %vm114_vm1, %v100_v47 }
  0x3f   :  { %1297 = vmatmul.msk.bf16.gmra.mxu3 %vm114_vm1, %v108_v9 }
  0x46   :  { %1274 = vmatmul.msk.bf16.gmra.mxu0 %vm114_vm1, %v85_v42  ;;  %1282 = vmatmul.msk.bf16.gmra.mxu1 %vm114_vm1, %v93_v43 }
  0x4a   :  { %1290 = vmatmul.msk.bf16.gmra.mxu2 %vm114_vm1, %v101_v59 }
  0x4f   :  { %1298 = vmatmul.msk.bf16.gmra.mxu3 %vm114_vm1, %v109_v21 }
  0x56   :  { %1275 = vmatmul.msk.bf16.gmra.mxu0 %vm114_vm1, %v86_v54  ;;  %1283 = vmatmul.msk.bf16.gmra.mxu1 %vm114_vm1, %v94_v55  ;;  %v111_v54 = vpack.c.bf16 %v78_v52, %v77_v51 }
  0x5a   :  { %1291 = vmatmul.msk.bf16.gmra.mxu2 %vm114_vm1, %v102_v7 }
  0x5f   :  { %1299 = vmatmul.msk.bf16.gmra.mxu3 %vm114_vm1, %v110_v31 }
  0x66   :  { %1276 = vmatmul.msk.bf16.gmra.mxu0 %vm114_vm1, %v87_v2  ;;  %1284 = vmatmul.msk.bf16.gmra.mxu1 %vm114_vm1, %v95_v3 }
  0x6a   :  { %1292 = vmatmul.msk.bf16.gmra.mxu2 %vm114_vm1, %v103_v19 }
  0x6f   :  { %1300 = vmatmul.msk.bf16.gmra.mxu3 %vm114_vm1, %v111_v54 }
  0x76   :  { %1277 = vmatmul.msk.bf16.gmra.mxu0 %vm114_vm1, %v88_v14  ;;  %1285 = vmatmul.msk.bf16.gmra.mxu1 %vm114_vm1, %v96_v15  ;;  %v112_v15 = vpack.c.bf16 %v80_v13, %v79_v12 }
  0x7a   :  { %1293 = vmatmul.msk.bf16.gmra.mxu2 %vm114_vm1, %v104_v29 }
  0x7f   :  { %1301 = vmatmul.msk.bf16.gmra.mxu3 %vm114_vm1, %v112_v15 }
  0x83   :  { %v224_v22 = vpop.f32.mrf.mxu0  ;;  %v1585_v23 = vpop.f32.mrf.mxu1 }
  0x84   :  { %v771_v24 = vpack.c.bf16 %v224_v22, %v224_v22  ;;  %v787_v25 = vpack.c.bf16 %v1585_v23, %v1585_v23  ;;  %v1036_v32 = vmul.f32 %v224_v22, %v224_v22  ;;  %v901_v33 = vsel %vm900_vm3, %v224_v22, 0.0 }
  0x86   :  { %836 = vst.msk [vmem:[%s2389_s2] sm:$0xf] %vm835_vm2, %v771_v24  ;;  %v1100_v41 = vsel %vm900_vm3, %v1036_v32, 0.0 }
  0x87   :  { %852 = vst.msk [vmem:[%s2389_s2 + $0x40] sm:$0xf] %vm835_vm2, %v787_v25 }
  0x8b   :  { %v226_v34 = vpop.f32.mrf.mxu0  ;;  %v1612_v35 = vpop.f32.mrf.mxu1 }
  0x8c   :  { %v772_v36 = vpack.c.bf16 %v226_v34, %v226_v34  ;;  %v902_v37 = vsel %vm900_vm3, %v226_v34, 0.0  ;;  %v1037_v38 = vmul.f32 %v226_v34, %v226_v34  ;;  %v788_v39 = vpack.c.bf16 %v1612_v35, %v1612_v35 }
  0x8d   :  { %v903_v40 = vadd.f32 %v902_v37, %v901_v33  ;;  %v1653_v62 = vpop.f32.mrf.mxu2 }
  0x8e   :  { %837 = vst.msk [vmem:[%s2389_s2 + $0x4] sm:$0xf] %vm835_vm2, %v772_v36  ;;  %v1101_v42 = vsel %vm900_vm3, %v1037_v38, 0.0  ;;  %v803_v2 = vpack.c.bf16 %v1653_v62, %v1653_v62 }
  0x8f   :  { %v1102_v43 = vadd.f32 %v1101_v42, %v1100_v41  ;;  %853 = vst.msk [vmem:[%s2389_s2 + $0x44] sm:$0xf] %vm835_vm2, %v788_v39 }
  0x90   :  { %868 = vst.msk [vmem:[%s2389_s2 + $0x80] sm:$0xf] %vm835_vm2, %v803_v2 }
  0x92   :  { %v1761_v36 = vpop.f32.mrf.mxu3 }
  0x93   :  { %v229_v44 = vpop.f32.mrf.mxu0  ;;  %v1627_v45 = vpop.f32.mrf.mxu1  ;;  %v819_v38 = vpack.c.bf16 %v1761_v36, %v1761_v36 }
  0x94   :  { %v773_v46 = vpack.c.bf16 %v229_v44, %v229_v44  ;;  %v904_v47 = vsel %vm900_vm3, %v229_v44, 0.0  ;;  %v1038_v48 = vmul.f32 %v229_v44, %v229_v44  ;;  %v789_v49 = vpack.c.bf16 %v1627_v45, %v1627_v45 }
  0x95   :  { %v905_v50 = vadd.f32 %v904_v47, %v903_v40  ;;  %v1675_v9 = vpop.f32.mrf.mxu2  ;;  %884 = vst.msk [vmem:[%s2389_s2 + $0xc0] sm:$0xf] %vm835_vm2, %v819_v38 }
  0x96   :  { %838 = vst.msk [vmem:[%s2389_s2 + $0x8] sm:$0xf] %vm835_vm2, %v773_v46  ;;  %v1103_v53 = vsel %vm900_vm3, %v1038_v48, 0.0  ;;  %v804_v11 = vpack.c.bf16 %v1675_v9, %v1675_v9 }
  0x97   :  { %v1104_v55 = vadd.f32 %v1103_v53, %v1102_v43  ;;  %854 = vst.msk [vmem:[%s2389_s2 + $0x48] sm:$0xf] %vm835_vm2, %v789_v49 }
  0x98   :  { %869 = vst.msk [vmem:[%s2389_s2 + $0x84] sm:$0xf] %vm835_vm2, %v804_v11 }
  0x9a   :  { %v1793_v44 = vpop.f32.mrf.mxu3 }
  0x9b   :  { %v231_v56 = vpop.f32.mrf.mxu0  ;;  %v1648_v57 = vpop.f32.mrf.mxu1  ;;  %v820_v47 = vpack.c.bf16 %v1793_v44, %v1793_v44 }
  0x9c   :  { %v774_v58 = vpack.c.bf16 %v231_v56, %v231_v56  ;;  %v906_v59 = vsel %vm900_vm3, %v231_v56, 0.0  ;;  %v1039_v60 = vmul.f32 %v231_v56, %v231_v56  ;;  %v790_v61 = vpack.c.bf16 %v1648_v57, %v1648_v57 }
  0x9d   :  { %v907_v63 = vadd.f32 %v906_v59, %v905_v50  ;;  %v1711_v21 = vpop.f32.mrf.mxu2  ;;  %885 = vst.msk [vmem:[%s2389_s2 + $0xc4] sm:$0xf] %vm835_vm2, %v820_v47 }
  0x9e   :  { %839 = vst.msk [vmem:[%s2389_s2 + $0xc] sm:$0xf] %vm835_vm2, %v774_v58  ;;  %v1105_v0 = vsel %vm900_vm3, %v1039_v60, 0.0  ;;  %v805_v22 = vpack.c.bf16 %v1711_v21, %v1711_v21 }
  0x9f   :  { %v1106_v1 = vadd.f32 %v1105_v0, %v1104_v55  ;;  %855 = vst.msk [vmem:[%s2389_s2 + $0x4c] sm:$0xf] %vm835_vm2, %v790_v61 }
  0xa0   :  { %870 = vst.msk [vmem:[%s2389_s2 + $0x88] sm:$0xf] %vm835_vm2, %v805_v22 }
  0xa2   :  { %v1825_v53 = vpop.f32.mrf.mxu3 }
  0xa3   :  { %v234_v3 = vpop.f32.mrf.mxu0  ;;  %v1670_v4 = vpop.f32.mrf.mxu1  ;;  %v821_v55 = vpack.c.bf16 %v1825_v53, %v1825_v53 }
  0xa4   :  { %v775_v5 = vpack.c.bf16 %v234_v3, %v234_v3  ;;  %v908_v6 = vsel %vm900_vm3, %v234_v3, 0.0  ;;  %v1040_v7 = vmul.f32 %v234_v3, %v234_v3  ;;  %v791_v8 = vpack.c.bf16 %v1670_v4, %v1670_v4 }
  0xa5   :  { %v1677_v10 = vadd.f32 %v908_v6, %v907_v63  ;;  %v1735_v28 = vpop.f32.mrf.mxu2  ;;  %886 = vst.msk [vmem:[%s2389_s2 + $0xc8] sm:$0xf] %vm835_vm2, %v821_v55 }
  0xa6   :  { %840 = vst.msk [vmem:[%s2389_s2 + $0x10] sm:$0xf] %vm835_vm2, %v775_v5  ;;  %v1107_v14 = vsel %vm900_vm3, %v1040_v7, 0.0  ;;  %v806_v29 = vpack.c.bf16 %v1735_v28, %v1735_v28 }
  0xa7   :  { %v1692_v16 = vadd.f32 %v1107_v14, %v1106_v1  ;;  %856 = vst.msk [vmem:[%s2389_s2 + $0x50] sm:$0xf] %vm835_vm2, %v791_v8 }
  0xa8   :  { %871 = vst.msk [vmem:[%s2389_s2 + $0x8c] sm:$0xf] %vm835_vm2, %v806_v29 }
  0xaa   :  { %v1857_v63 = vpop.f32.mrf.mxu3 }
  0xab   :  { %v1703_v17 = vpop.f32.mrf.mxu0  ;;  %v1705_v18 = vpop.f32.mrf.mxu1  ;;  %v822_v1 = vpack.c.bf16 %v1857_v63, %v1857_v63 }
  0xac   :  { %v776_v19 = vpack.c.bf16 %v1703_v17, %v1703_v17  ;;  %v792_v20 = vpack.c.bf16 %v1705_v18, %v1705_v18  ;;  %v1041_v13 = vmul.f32 %v1703_v17, %v1703_v17 }
  0xad   :  { %v1759_v34 = vpop.f32.mrf.mxu2  ;;  %887 = vst.msk [vmem:[%s2389_s2 + $0xcc] sm:$0xf] %vm835_vm2, %v822_v1 }
  0xae   :  { %841 = vst.msk [vmem:[%s2389_s2 + $0x14] sm:$0xf] %vm835_vm2, %v776_v19  ;;  %v807_v37 = vpack.c.bf16 %v1759_v34, %v1759_v34 }
  0xaf   :  { %857 = vst.msk [vmem:[%s2389_s2 + $0x54] sm:$0xf] %vm835_vm2, %v792_v20 }
  0xb0   :  { %872 = vst.msk [vmem:[%s2389_s2 + $0x90] sm:$0xf] %vm835_vm2, %v807_v37 }
  0xb2   :  { %v1885_v8 = vpop.f32.mrf.mxu3 }
  0xb3   :  { %v1727_v24 = vpop.f32.mrf.mxu0  ;;  %v1729_v25 = vpop.f32.mrf.mxu1  ;;  %v823_v29 = vpack.c.bf16 %v1885_v8, %v1885_v8 }
  0xb4   :  { %v777_v26 = vpack.c.bf16 %v1727_v24, %v1727_v24  ;;  %v793_v27 = vpack.c.bf16 %v1729_v25, %v1729_v25 }
  0xb5   :  { %v1791_v43 = vpop.f32.mrf.mxu2  ;;  %888 = vst.msk [vmem:[%s2389_s2 + $0xd0] sm:$0xf] %vm835_vm2, %v823_v29 }
  0xb6   :  { %842 = vst.msk [vmem:[%s2389_s2 + $0x18] sm:$0xf] %vm835_vm2, %v777_v26  ;;  %v808_v46 = vpack.c.bf16 %v1791_v43, %v1791_v43  ;;  %v910_v26 = vsel %vm900_vm3, %v1703_v17, 0.0  ;;  %v1109_v17 = vsel %vm900_vm3, %v1041_v13, 0.0 }
  0xb7   :  { %858 = vst.msk [vmem:[%s2389_s2 + $0x58] sm:$0xf] %vm835_vm2, %v793_v27  ;;  %v1042_v27 = vmul.f32 %v1727_v24, %v1727_v24  ;;  %v911_v38 = vadd.f32 %v910_v26, %v1677_v10  ;;  %v1110_v10 = vadd.f32 %v1109_v17, %v1692_v16 }
  0xb8   :  { %873 = vst.msk [vmem:[%s2389_s2 + $0x94] sm:$0xf] %vm835_vm2, %v808_v46 }
  0xba   :  { %v1903_v20 = vpop.f32.mrf.mxu3 }
  0xbb   :  { %v1751_v30 = vpop.f32.mrf.mxu0  ;;  %v1753_v31 = vpop.f32.mrf.mxu1 }
  0xbc   :  { %v778_v32 = vpack.c.bf16 %v1751_v30, %v1751_v30  ;;  %v794_v33 = vpack.c.bf16 %v1753_v31, %v1753_v31 }
  0xbd   :  { %v1823_v52 = vpop.f32.mrf.mxu2 }
  0xbe   :  { %843 = vst.msk [vmem:[%s2389_s2 + $0x1c] sm:$0xf] %vm835_vm2, %v778_v32  ;;  %v809_v54 = vpack.c.bf16 %v1823_v52, %v1823_v52  ;;  %v1043_v32 = vmul.f32 %v1751_v30, %v1751_v30 }
  0xbf   :  { %859 = vst.msk [vmem:[%s2389_s2 + $0x5c] sm:$0xf] %vm835_vm2, %v794_v33  ;;  %v912_v33 = vsel %vm900_vm3, %v1727_v24, 0.0  ;;  %v1111_v24 = vsel %vm900_vm3, %v1042_v27, 0.0 }
  0xc0   :  { %874 = vst.msk [vmem:[%s2389_s2 + $0x98] sm:$0xf] %vm835_vm2, %v809_v54  ;;  %v913_v47 = vadd.f32 %v912_v33, %v911_v38  ;;  %v1112_v1 = vadd.f32 %v1111_v24, %v1110_v10 }
  0xc3   :  { %v1783_v39 = vpop.f32.mrf.mxu0  ;;  %v1785_v40 = vpop.f32.mrf.mxu1 }
  0xc4   :  { %v779_v41 = vpack.c.bf16 %v1783_v39, %v1783_v39  ;;  %v795_v42 = vpack.c.bf16 %v1785_v40, %v1785_v40  ;;  %v1044_v46 = vmul.f32 %v1783_v39, %v1783_v39 }
  0xc5   :  { %v1855_v61 = vpop.f32.mrf.mxu2 }
  0xc6   :  { %844 = vst.msk [vmem:[%s2389_s2 + $0x20] sm:$0xf] %vm835_vm2, %v779_v41  ;;  %v810_v0 = vpack.c.bf16 %v1855_v61, %v1855_v61  ;;  %v824_v41 = vpack.c.bf16 %v1903_v20, %v1903_v20 }
  0xc7   :  { %860 = vst.msk [vmem:[%s2389_s2 + $0x60] sm:$0xf] %vm835_vm2, %v795_v42  ;;  %v914_v42 = vsel %vm900_vm3, %v1751_v30, 0.0  ;;  %v916_v30 = vsel %vm900_vm3, %v1783_v39, 0.0 }
  0xc8   :  { %875 = vst.msk [vmem:[%s2389_s2 + $0x9c] sm:$0xf] %vm835_vm2, %v810_v0  ;;  %v1964_v0 = vpop.f32.mrf.mxu3 }
  0xc9   :  { %889 = vst.msk [vmem:[%s2389_s2 + $0xd4] sm:$0xf] %vm835_vm2, %v824_v41 }
  0xcb   :  { %v1815_v48 = vpop.f32.mrf.mxu0  ;;  %v1817_v49 = vpop.f32.mrf.mxu1 }
  0xcc   :  { %v780_v50 = vpack.c.bf16 %v1815_v48, %v1815_v48  ;;  %v796_v51 = vpack.c.bf16 %v1817_v49, %v1817_v49  ;;  %v1045_v55 = vmul.f32 %v1815_v48, %v1815_v48  ;;  %v918_v13 = vsel %vm900_vm3, %v1815_v48, 0.0 }
  0xcd   :  { %v1883_v7 = vpop.f32.mrf.mxu2 }
  0xce   :  { %845 = vst.msk [vmem:[%s2389_s2 + $0x24] sm:$0xf] %vm835_vm2, %v780_v50  ;;  %v811_v22 = vpack.c.bf16 %v1883_v7, %v1883_v7  ;;  %v1113_v50 = vsel %vm900_vm3, %v1043_v32, 0.0  ;;  %v1117_v26 = vsel %vm900_vm3, %v1045_v55, 0.0 }
  0xcf   :  { %861 = vst.msk [vmem:[%s2389_s2 + $0x64] sm:$0xf] %vm835_vm2, %v796_v51 }
  0xd0   :  { %876 = vst.msk [vmem:[%s2389_s2 + $0xa0] sm:$0xf] %vm835_vm2, %v811_v22 }
  0xd3   :  { %v1847_v56 = vpop.f32.mrf.mxu0  ;;  %v1849_v58 = vpop.f32.mrf.mxu1 }
  0xd4   :  { %v781_v59 = vpack.c.bf16 %v1847_v56, %v1847_v56  ;;  %v797_v60 = vpack.c.bf16 %v1849_v58, %v1849_v58  ;;  %v1046_v39 = vmul.f32 %v1847_v56, %v1847_v56  ;;  %v920_v48 = vsel %vm900_vm3, %v1847_v56, 0.0 }
  0xd5   :  { %v1901_v19 = vpop.f32.mrf.mxu2 }
  0xd6   :  { %846 = vst.msk [vmem:[%s2389_s2 + $0x28] sm:$0xf] %vm835_vm2, %v781_v59  ;;  %v812_v37 = vpack.c.bf16 %v1901_v19, %v1901_v19  ;;  %v1119_v32 = vsel %vm900_vm3, %v1046_v39, 0.0 }
  0xd7   :  { %862 = vst.msk [vmem:[%s2389_s2 + $0x68] sm:$0xf] %vm835_vm2, %v797_v60 }
  0xd8   :  { %877 = vst.msk [vmem:[%s2389_s2 + $0xa4] sm:$0xf] %vm835_vm2, %v812_v37 }
  0xdb   :  { %v251_v2 = vpop.f32.mrf.mxu0  ;;  %v1879_v3 = vpop.f32.mrf.mxu1 }
  0xdc   :  { %v782_v5 = vpack.c.bf16 %v251_v2, %v251_v2  ;;  %v798_v6 = vpack.c.bf16 %v1879_v3, %v1879_v3  ;;  %v1047_v22 = vmul.f32 %v251_v2, %v251_v2  ;;  %v922_v17 = vsel %vm900_vm3, %v251_v2, 0.0 }
  0xdd   :  { %v1962_v60 = vpop.f32.mrf.mxu2 }
  0xde   :  { %847 = vst.msk [vmem:[%s2389_s2 + $0x2c] sm:$0xf] %vm835_vm2, %v782_v5  ;;  %v915_v5 = vadd.f32 %v914_v42, %v913_v47  ;;  %v1121_v41 = vsel %vm900_vm3, %v1047_v22, 0.0 }
  0xdf   :  { %863 = vst.msk [vmem:[%s2389_s2 + $0x6c] sm:$0xf] %vm835_vm2, %v798_v6  ;;  %v1115_v6 = vsel %vm900_vm3, %v1044_v46, 0.0 }
  0xe3   :  { %v254_v11 = vpop.f32.mrf.mxu0  ;;  %v1895_v12 = vpop.f32.mrf.mxu1 }
  0xe4   :  { %v783_v14 = vpack.c.bf16 %v254_v11, %v254_v11  ;;  %v799_v15 = vpack.c.bf16 %v1895_v12, %v1895_v12  ;;  %v1048_v33 = vmul.f32 %v254_v11, %v254_v11  ;;  %v924_v46 = vsel %vm900_vm3, %v254_v11, 0.0 }
  0xe6   :  { %848 = vst.msk [vmem:[%s2389_s2 + $0x30] sm:$0xf] %vm835_vm2, %v783_v14  ;;  %v1114_v14 = vadd.f32 %v1113_v50, %v1112_v1  ;;  %v1990_v50 = vpop.f32.mrf.mxu2 }
  0xe7   :  { %864 = vst.msk [vmem:[%s2389_s2 + $0x70] sm:$0xf] %vm835_vm2, %v799_v15  ;;  %v917_v15 = vadd.f32 %v916_v30, %v915_v5  ;;  %v1992_v30 = vpop.f32.mrf.mxu3  ;;  %v825_v5 = vpack.c.bf16 %v1964_v0, %v1964_v0 }
  0xe8   :  { %v1116_v27 = vadd.f32 %v1115_v6, %v1114_v14  ;;  %v814_v14 = vpack.c.bf16 %v1990_v50, %v1990_v50 }
  0xe9   :  { %v919_v29 = vadd.f32 %v918_v13, %v917_v15  ;;  %890 = vst.msk [vmem:[%s2389_s2 + $0xd8] sm:$0xf] %vm835_vm2, %v825_v5  ;;  %v934_v5 = vsel %vm900_vm3, %v1612_v35, 0.0 }
  0xea   :  { %v1118_v37 = vadd.f32 %v1117_v26, %v1116_v27  ;;  %v826_v26 = vpack.c.bf16 %v1992_v30, %v1992_v30  ;;  %879 = vst.msk [vmem:[%s2389_s2 + $0xac] sm:$0xf] %vm835_vm2, %v814_v14  ;;  %v1052_v27 = vmul.f32 %v1585_v23, %v1585_v23  ;;  %v1055_v14 = vmul.f32 %v1648_v57, %v1648_v57 }
  0xeb   :  { %v256_v51 = vpop.f32.mrf.mxu0  ;;  %v1950_v54 = vpop.f32.mrf.mxu1  ;;  %v921_v38 = vadd.f32 %v920_v48, %v919_v29 }
  0xec   :  { %v784_v59 = vpack.c.bf16 %v256_v51, %v256_v51  ;;  %v800_v16 = vpack.c.bf16 %v1950_v54, %v1950_v54  ;;  %v1049_v10 = vmul.f32 %v256_v51, %v256_v51  ;;  %v1120_v2 = vadd.f32 %v1119_v32, %v1118_v37  ;;  %891 = vst.msk [vmem:[%s2389_s2 + $0xdc] sm:$0xf] %vm835_vm2, %v826_v26 }
  0xed   :  { %v923_v55 = vadd.f32 %v922_v17, %v921_v38  ;;  %v926_v1 = vsel %vm900_vm3, %v256_v51, 0.0 }
  0xee   :  { %849 = vst.msk [vmem:[%s2389_s2 + $0x34] sm:$0xf] %vm835_vm2, %v784_v59  ;;  %v813_v59 = vpack.c.bf16 %v1962_v60, %v1962_v60  ;;  %v1122_v6 = vadd.f32 %v1121_v41, %v1120_v2  ;;  %v1125_v39 = vsel %vm900_vm3, %v1049_v10, 0.0  ;;  %v932_v2 = vsel %vm900_vm3, %v1585_v23, 0.0 }
  0xef   :  { %865 = vst.msk [vmem:[%s2389_s2 + $0x74] sm:$0xf] %vm835_vm2, %v800_v16  ;;  %v1123_v16 = vsel %vm900_vm3, %v1048_v33, 0.0  ;;  %v925_v13 = vadd.f32 %v924_v46, %v923_v55  ;;  %v2038_v46 = vpop.f32.mrf.mxu2  ;;  %v2040_v10 = vpop.f32.mrf.mxu3  ;;  %v1053_v55 = vmul.f32 %v1612_v35, %v1612_v35  ;;  %v1131_v23 = vsel %vm900_vm3, %v1052_v27, 0.0 }
  0xf0   :  { %878 = vst.msk [vmem:[%s2389_s2 + $0xa8] sm:$0xf] %vm835_vm2, %v813_v59  ;;  %v1124_v15 = vadd.f32 %v1123_v16, %v1122_v6  ;;  %v1054_v16 = vmul.f32 %v1627_v45, %v1627_v45  ;;  %v1056_v35 = vmul.f32 %v1670_v4, %v1670_v4  ;;  %v815_v27 = vpack.c.bf16 %v2038_v46, %v2038_v46 }
  0xf1   :  { %v927_v22 = vadd.f32 %v926_v1, %v925_v13 }
  0xf2   :  { %v1126_v29 = vadd.f32 %v1125_v39, %v1124_v15  ;;  %v1133_v39 = vsel %vm900_vm3, %v1053_v55, 0.0  ;;  %v1135_v15 = vsel %vm900_vm3, %v1054_v16, 0.0  ;;  %880 = vst.msk [vmem:[%s2389_s2 + $0xb0] sm:$0xf] %vm835_vm2, %v815_v27  ;;  %v942_v55 = vsel %vm900_vm3, %v1705_v18, 0.0 }
  0xf3   :  { %v259_v24 = vpop.f32.mrf.mxu0  ;;  %v1985_v42 = vpop.f32.mrf.mxu1 }
  0xf4   :  { %v785_v47 = vpack.c.bf16 %v259_v24, %v259_v24  ;;  %v801_v56 = vpack.c.bf16 %v1985_v42, %v1985_v42  ;;  %v1050_v11 = vmul.f32 %v259_v24, %v259_v24  ;;  %v928_v51 = vsel %vm900_vm3, %v259_v24, 0.0 }
  0xf5   :  { %v929_v32 = vadd.f32 %v928_v51, %v927_v22  ;;  %v936_v51 = vsel %vm900_vm3, %v1627_v45, 0.0 }
  0xf6   :  { %850 = vst.msk [vmem:[%s2389_s2 + $0x38] sm:$0xf] %vm835_vm2, %v785_v47  ;;  %v1127_v48 = vsel %vm900_vm3, %v1050_v11, 0.0 }
  0xf7   :  { %866 = vst.msk [vmem:[%s2389_s2 + $0x78] sm:$0xf] %vm835_vm2, %v801_v56  ;;  %v1128_v47 = vadd.f32 %v1127_v48, %v1126_v29  ;;  %v938_v48 = vsel %vm900_vm3, %v1648_v57, 0.0  ;;  %v827_v29 = vpack.c.bf16 %v2040_v10, %v2040_v10  ;;  %v2074_v45 = vpop.f32.mrf.mxu2  ;;  %v940_v57 = vsel %vm900_vm3, %v1670_v4, 0.0 }
  0xf9   :  { %892 = vst.msk [vmem:[%s2389_s2 + $0xe0] sm:$0xf] %vm835_vm2, %v827_v29 }
  0xfb   :  { %v261_v17 = vpop.f32.mrf.mxu0  ;;  %v2029_v33 = vpop.f32.mrf.mxu1 }
  0xfc   :  { %v786_v37 = vpack.c.bf16 %v261_v17, %v261_v17  ;;  %v930_v38 = vsel %vm900_vm3, %v261_v17, 0.0  ;;  %v1051_v41 = vmul.f32 %v261_v17, %v261_v17  ;;  %v802_v24 = vpack.c.bf16 %v2029_v33, %v2029_v33 }
  0xfd   :  { %v931_v56 = vadd.f32 %v930_v38, %v929_v32  ;;  %v2076_v32 = vpop.f32.mrf.mxu3  ;;  %v1137_v38 = vsel %vm900_vm3, %v1055_v14, 0.0 }
  0xfe   :  { %851 = vst.msk [vmem:[%s2389_s2 + $0x3c] sm:$0xf] %vm835_vm2, %v786_v37  ;;  %v1129_v59 = vsel %vm900_vm3, %v1051_v41, 0.0  ;;  %v1057_v41 = vmul.f32 %v1705_v18, %v1705_v18  ;;  %v828_v4 = vpack.c.bf16 %v2076_v32, %v2076_v32  ;;  %v944_v18 = vsel %vm900_vm3, %v1729_v25, 0.0 }
  0xff   :  { %v933_v1 = vadd.f32 %v932_v2, %v931_v56  ;;  %v1130_v11 = vadd.f32 %v1129_v59, %v1128_v47  ;;  %867 = vst.msk [vmem:[%s2389_s2 + $0x7c] sm:$0xf] %vm835_vm2, %v802_v24  ;;  %v816_v24 = vpack.c.bf16 %v2074_v45, %v2074_v45  ;;  %v1139_v2 = vsel %vm900_vm3, %v1056_v35, 0.0  ;;  %v2118_v14 = vpop.f32.mrf.mxu2 }
 0x100   :  { %v1058_v59 = vmul.f32 %v1729_v25, %v1729_v25  ;;  %893 = vst.msk [vmem:[%s2389_s2 + $0xe4] sm:$0xf] %vm835_vm2, %v828_v4  ;;  %v1061_v35 = vmul.f32 %v1817_v49, %v1817_v49 }
 0x101   :  { %v935_v6 = vadd.f32 %v934_v5, %v933_v1  ;;  %v1132_v13 = vadd.f32 %v1131_v23, %v1130_v11  ;;  %881 = vst.msk [vmem:[%s2389_s2 + $0xb4] sm:$0xf] %vm835_vm2, %v816_v24  ;;  %v1141_v11 = vsel %vm900_vm3, %v1057_v41, 0.0  ;;  %v1059_v23 = vmul.f32 %v1753_v31, %v1753_v31 }
 0x102   :  { %v1149_v41 = vsel %vm900_vm3, %v1061_v35, 0.0  ;;  %v1063_v24 = vmul.f32 %v1879_v3, %v1879_v3  ;;  %v1067_v35 = vmul.f32 %v2029_v33, %v2029_v33 }
 0x103   :  { %v937_v22 = vadd.f32 %v936_v51, %v935_v6  ;;  %v1134_v26 = vadd.f32 %v1133_v39, %v1132_v13  ;;  %v1143_v13 = vsel %vm900_vm3, %v1058_v59, 0.0  ;;  %v946_v39 = vsel %vm900_vm3, %v1753_v31, 0.0 }
 0x104   :  { %v1060_v51 = vmul.f32 %v1785_v40, %v1785_v40  ;;  %v1145_v25 = vsel %vm900_vm3, %v1059_v23, 0.0  ;;  %v1062_v31 = vmul.f32 %v1849_v58, %v1849_v58  ;;  %v1065_v23 = vmul.f32 %v1950_v54, %v1950_v54 }
 0x105   :  { %v939_v17 = vadd.f32 %v938_v48, %v937_v22  ;;  %v1136_v37 = vadd.f32 %v1135_v15, %v1134_v26  ;;  %v2120_v15 = vpop.f32.mrf.mxu3  ;;  %v948_v48 = vsel %vm900_vm3, %v1785_v40, 0.0  ;;  %v952_v40 = vsel %vm900_vm3, %v1849_v58, 0.0 }
 0x106   :  { %v829_v59 = vpack.c.bf16 %v2120_v15, %v2120_v15 }
 0x107   :  { %v941_v47 = vadd.f32 %v940_v57, %v939_v17  ;;  %v1138_v56 = vadd.f32 %v1137_v38, %v1136_v37  ;;  %v1147_v17 = vsel %vm900_vm3, %v1060_v51, 0.0  ;;  %v950_v37 = vsel %vm900_vm3, %v1817_v49, 0.0  ;;  %v2146_v58 = vpop.f32.mrf.mxu2 }
 0x108   :  { %v1064_v49 = vmul.f32 %v1895_v12, %v1895_v12  ;;  %894 = vst.msk [vmem:[%s2389_s2 + $0xe8] sm:$0xf] %vm835_vm2, %v829_v59  ;;  %v958_v51 = vsel %vm900_vm3, %v1950_v54, 0.0  ;;  %v960_v54 = vsel %vm900_vm3, %v1985_v42, 0.0 }
 0x109   :  { %v943_v16 = vadd.f32 %v942_v55, %v941_v47  ;;  %v1140_v1 = vadd.f32 %v1139_v2, %v1138_v56  ;;  %v1151_v47 = vsel %vm900_vm3, %v1062_v31, 0.0  ;;  %v954_v2 = vsel %vm900_vm3, %v1879_v3, 0.0 }
 0x10a   :  { %v817_v55 = vpack.c.bf16 %v2118_v14, %v2118_v14  ;;  %v956_v3 = vsel %vm900_vm3, %v1895_v12, 0.0 }
 0x10b   :  { %v1142_v5 = vadd.f32 %v1141_v11, %v1140_v1  ;;  %v945_v6 = vadd.f32 %v944_v18, %v943_v16  ;;  %v1153_v18 = vsel %vm900_vm3, %v1063_v24, 0.0  ;;  %v1161_v24 = vsel %vm900_vm3, %v1067_v35, 0.0 }
 0x10c   :  { %882 = vst.msk [vmem:[%s2389_s2 + $0xb8] sm:$0xf] %vm835_vm2, %v817_v55 }
 0x10d   :  { %v947_v22 = vadd.f32 %v946_v39, %v945_v6  ;;  %v1144_v26 = vadd.f32 %v1143_v13, %v1142_v5  ;;  %v2148_v16 = vpop.f32.mrf.mxu3  ;;  %v818_v5 = vpack.c.bf16 %v2146_v58, %v2146_v58  ;;  %v1155_v39 = vsel %vm900_vm3, %v1064_v49, 0.0 }
 0x10e   :  { %v830_v12 = vpack.c.bf16 %v2148_v16, %v2148_v16 }
 0x10f   :  { %v949_v27 = vadd.f32 %v948_v48, %v947_v22  ;;  %v1146_v29 = vadd.f32 %v1145_v25, %v1144_v26  ;;  %v1066_v22 = vmul.f32 %v1985_v42, %v1985_v42  ;;  %883 = vst.msk [vmem:[%s2389_s2 + $0xbc] sm:$0xf] %vm835_vm2, %v818_v5  ;;  %v1157_v48 = vsel %vm900_vm3, %v1065_v23, 0.0 }
 0x110   :  { %895 = vst.msk [vmem:[%s2389_s2 + $0xec] sm:$0xf] %vm835_vm2, %v830_v12  ;;  %v964_v42 = vsel %vm900_vm3, %v1653_v62, 0.0  ;;  %v1072_v23 = vmul.f32 %v1759_v34, %v1759_v34 }
 0x111   :  { %v951_v38 = vadd.f32 %v950_v37, %v949_v27  ;;  %v1148_v57 = vadd.f32 %v1147_v17, %v1146_v29  ;;  %v1068_v29 = vmul.f32 %v1653_v62, %v1653_v62  ;;  %v1159_v17 = vsel %vm900_vm3, %v1066_v22, 0.0 }
 0x112   :  { %v962_v37 = vsel %vm900_vm3, %v2029_v33, 0.0  ;;  %v1070_v33 = vmul.f32 %v1711_v21, %v1711_v21  ;;  %v968_v62 = vsel %vm900_vm3, %v1711_v21, 0.0 }
 0x113   :  { %v953_v56 = vadd.f32 %v952_v40, %v951_v38  ;;  %v1150_v4 = vadd.f32 %v1149_v41, %v1148_v57  ;;  %v1069_v40 = vmul.f32 %v1675_v9, %v1675_v9 }
 0x115   :  { %v955_v1 = vadd.f32 %v954_v2, %v953_v56  ;;  %v1152_v11 = vadd.f32 %v1151_v47, %v1150_v4  ;;  %v2190_v38 = vpop.f32.mrf.mxu3  ;;  %v1163_v4 = vsel %vm900_vm3, %v1068_v29, 0.0  ;;  %v966_v2 = vsel %vm900_vm3, %v1675_v9, 0.0 }
 0x116   :  { %v1165_v59 = vsel %vm900_vm3, %v1069_v40, 0.0  ;;  %v970_v9 = vsel %vm900_vm3, %v1735_v28, 0.0  ;;  %v831_v5 = vpack.c.bf16 %v2190_v38, %v2190_v38  ;;  %v1075_v29 = vmul.f32 %v1855_v61, %v1855_v61 }
 0x117   :  { %v957_v6 = vadd.f32 %v956_v3, %v955_v1  ;;  %v1154_v13 = vadd.f32 %v1153_v18, %v1152_v11  ;;  %v1071_v1 = vmul.f32 %v1735_v28, %v1735_v28  ;;  %v1167_v3 = vsel %vm900_vm3, %v1070_v33, 0.0 }
 0x118   :  { %v1073_v28 = vmul.f32 %v1791_v43, %v1791_v43  ;;  %896 = vst.msk [vmem:[%s2389_s2 + $0xf0] sm:$0xf] %vm835_vm2, %v831_v5 }
 0x119   :  { %v1156_v26 = vadd.f32 %v1155_v39, %v1154_v13  ;;  %v959_v25 = vadd.f32 %v958_v51, %v957_v6  ;;  %v1169_v39 = vsel %vm900_vm3, %v1071_v1, 0.0  ;;  %v972_v51 = vsel %vm900_vm3, %v1759_v34, 0.0 }
 0x11a   :  { %v974_v34 = vsel %vm900_vm3, %v1791_v43, 0.0  ;;  %v978_v43 = vsel %vm900_vm3, %v1855_v61, 0.0  ;;  %v982_v61 = vsel %vm900_vm3, %v1901_v19, 0.0  ;;  %v1079_v1 = vmul.f32 %v1990_v50, %v1990_v50 }
 0x11b   :  { %v1158_v31 = vadd.f32 %v1157_v48, %v1156_v26  ;;  %v961_v27 = vadd.f32 %v960_v54, %v959_v25  ;;  %v1171_v25 = vsel %vm900_vm3, %v1072_v23, 0.0  ;;  %v1074_v48 = vmul.f32 %v1823_v52, %v1823_v52 }
 0x11d   :  { %v1160_v57 = vadd.f32 %v1159_v17, %v1158_v31  ;;  %v963_v41 = vadd.f32 %v962_v37, %v961_v27  ;;  %v2214_v6 = vpop.f32.mrf.mxu3  ;;  %v1173_v31 = vsel %vm900_vm3, %v1073_v28, 0.0  ;;  %v976_v27 = vsel %vm900_vm3, %v1823_v52, 0.0 }
 0x11e   :  { %v832_v12 = vpack.c.bf16 %v2214_v6, %v2214_v6  ;;  %v980_v52 = vsel %vm900_vm3, %v1883_v7, 0.0 }
 0x11f   :  { %v965_v47 = vadd.f32 %v964_v42, %v963_v41  ;;  %v1162_v56 = vadd.f32 %v1161_v24, %v1160_v57  ;;  %v1175_v57 = vsel %vm900_vm3, %v1074_v48, 0.0  ;;  %v1076_v41 = vmul.f32 %v1883_v7, %v1883_v7 }
 0x120   :  { %897 = vst.msk [vmem:[%s2389_s2 + $0xf4] sm:$0xf] %vm835_vm2, %v832_v12  ;;  %v984_v7 = vsel %vm900_vm3, %v1962_v60, 0.0  ;;  %v1185_v12 = vsel %vm900_vm3, %v1079_v1, 0.0 }
 0x121   :  { %v967_v49 = vadd.f32 %v966_v2, %v965_v47  ;;  %v1164_v55 = vadd.f32 %v1163_v4, %v1162_v56  ;;  %v1177_v47 = vsel %vm900_vm3, %v1075_v29, 0.0  ;;  %v1077_v56 = vmul.f32 %v1901_v19, %v1901_v19 }
 0x122   :  { %v1179_v33 = vsel %vm900_vm3, %v1076_v41, 0.0  ;;  %v986_v19 = vsel %vm900_vm3, %v1990_v50, 0.0  ;;  %v1081_v50 = vmul.f32 %v2074_v45, %v2074_v45  ;;  %v1084_v29 = vmul.f32 %v1761_v36, %v1761_v36 }
 0x123   :  { %v969_v11 = vadd.f32 %v968_v62, %v967_v49  ;;  %v1166_v18 = vadd.f32 %v1165_v59, %v1164_v55  ;;  %v1078_v49 = vmul.f32 %v1962_v60, %v1962_v60  ;;  %v1181_v62 = vsel %vm900_vm3, %v1077_v56, 0.0 }
 0x124   :  { %v1189_v48 = vsel %vm900_vm3, %v1081_v50, 0.0 }
 0x125   :  { %v971_v13 = vadd.f32 %v970_v9, %v969_v11  ;;  %v1168_v21 = vadd.f32 %v1167_v3, %v1166_v18  ;;  %v2246_v42 = vpop.f32.mrf.mxu3  ;;  %v1183_v3 = vsel %vm900_vm3, %v1078_v49, 0.0  ;;  %v1080_v9 = vmul.f32 %v2038_v46, %v2038_v46 }
 0x126   :  { %v833_v23 = vpack.c.bf16 %v2246_v42, %v2246_v42 }
 0x127   :  { %v973_v22 = vadd.f32 %v972_v51, %v971_v13  ;;  %v1170_v26 = vadd.f32 %v1169_v39, %v1168_v21  ;;  %v988_v39 = vsel %vm900_vm3, %v2038_v46, 0.0  ;;  %v990_v46 = vsel %vm900_vm3, %v2074_v45, 0.0 }
 0x128   :  { %898 = vst.msk [vmem:[%s2389_s2 + $0xf8] sm:$0xf] %vm835_vm2, %v833_v23 }
 0x129   :  { %v975_v54 = vadd.f32 %v974_v34, %v973_v22  ;;  %v1172_v35 = vadd.f32 %v1171_v25, %v1170_v26  ;;  %v1187_v22 = vsel %vm900_vm3, %v1080_v9, 0.0  ;;  %v1082_v26 = vmul.f32 %v2118_v14, %v2118_v14 }
 0x12a   :  { %v1090_v9 = vmul.f32 %v1964_v0, %v1964_v0 }
 0x12b   :  { %v1174_v17 = vadd.f32 %v1173_v31, %v1172_v35  ;;  %v977_v37 = vadd.f32 %v976_v27, %v975_v54  ;;  %v992_v54 = vsel %vm900_vm3, %v2118_v14, 0.0  ;;  %v1083_v35 = vmul.f32 %v2146_v58, %v2146_v58 }
 0x12c   :  { %v1191_v45 = vsel %vm900_vm3, %v1082_v26, 0.0  ;;  %v1085_v14 = vmul.f32 %v1793_v44, %v1793_v44  ;;  %v1207_v50 = vsel %vm900_vm3, %v1090_v9, 0.0  ;;  %v1093_v26 = vmul.f32 %v2076_v32, %v2076_v32 }
 0x12d   :  { %v979_v40 = vadd.f32 %v978_v43, %v977_v37  ;;  %v1176_v24 = vadd.f32 %v1175_v57, %v1174_v17  ;;  %v2270_v5 = vpop.f32.mrf.mxu3  ;;  %v994_v17 = vsel %vm900_vm3, %v2146_v58, 0.0  ;;  %v996_v43 = vsel %vm900_vm3, %v1761_v36, 0.0 }
 0x12e   :  { %v834_v21 = vpack.c.bf16 %v2270_v5, %v2270_v5  ;;  %v1193_v41 = vsel %vm900_vm3, %v1083_v35, 0.0  ;;  %v1086_v58 = vmul.f32 %v1825_v53, %v1825_v53  ;;  %v1000_v36 = vsel %vm900_vm3, %v1825_v53, 0.0 }
 0x12f   :  { %v981_v4 = vadd.f32 %v980_v52, %v979_v40  ;;  %v1178_v2 = vadd.f32 %v1177_v47, %v1176_v24  ;;  %v1195_v47 = vsel %vm900_vm3, %v1084_v29, 0.0  ;;  %v998_v52 = vsel %vm900_vm3, %v1793_v44, 0.0 }
 0x130   :  { %899 = vst.msk [vmem:[%s2389_s2 + $0xfc] sm:$0xf] %vm835_vm2, %v834_v21  ;;  %v1002_v44 = vsel %vm900_vm3, %v1857_v63, 0.0  ;;  %v1004_v53 = vsel %vm900_vm3, %v1885_v8, 0.0  ;;  %v1091_v21 = vmul.f32 %v1992_v30, %v1992_v30  ;;  %v1095_v29 = vmul.f32 %v2148_v16, %v2148_v16  ;;  %s1359_s2 = smov [#allocation2]  }
 0x131   :  { %v983_v55 = vadd.f32 %v982_v61, %v981_v4  ;;  %v1180_v59 = vadd.f32 %v1179_v33, %v1178_v2  ;;  %v1197_v2 = vsel %vm900_vm3, %v1085_v14, 0.0  ;;  %v1087_v33 = vmul.f32 %v1857_v63, %v1857_v63  ;;  %s1241_s25 = sshll.u32 %s1359_s2, 4  ;;  %s1242_s25 = int_to_ptr.vmem [resolvable:$true] %s1241_s25 }
 0x132   :  { %v1006_v63 = vsel %vm900_vm3, %v1903_v20, 0.0 }
 0x133   :  { %v985_v11 = vadd.f32 %v984_v7, %v983_v55  ;;  %v1182_v18 = vadd.f32 %v1181_v62, %v1180_v59  ;;  %v1199_v55 = vsel %vm900_vm3, %v1086_v58, 0.0  ;;  %v1088_v59 = vmul.f32 %v1885_v8, %v1885_v8 }
 0x134   :  { %v1201_v1 = vsel %vm900_vm3, %v1087_v33, 0.0  ;;  %v1008_v8 = vsel %vm900_vm3, %v1964_v0, 0.0  ;;  %v1012_v0 = vsel %vm900_vm3, %v2040_v10, 0.0  ;;  %v1098_v58 = vmul.f32 %v2246_v42, %v2246_v42 }
 0x135   :  { %v987_v13 = vadd.f32 %v986_v19, %v985_v11  ;;  %v1184_v60 = vadd.f32 %v1183_v3, %v1182_v18  ;;  %v1089_v11 = vmul.f32 %v1903_v20, %v1903_v20  ;;  %v1203_v19 = vsel %vm900_vm3, %v1088_v59, 0.0 }
 0x136   :  { %v1010_v20 = vsel %vm900_vm3, %v1992_v30, 0.0  ;;  %v1014_v30 = vsel %vm900_vm3, %v2076_v32, 0.0  ;;  %v1018_v32 = vsel %vm900_vm3, %v2148_v16, 0.0  ;;  %v1022_v16 = vsel %vm900_vm3, %v2214_v6, 0.0 }
 0x137   :  { %v1186_v51 = vadd.f32 %v1185_v12, %v1184_v60  ;;  %v989_v28 = vadd.f32 %v988_v39, %v987_v13  ;;  %v1205_v60 = vsel %vm900_vm3, %v1089_v11, 0.0 }
 0x139   :  { %v1188_v25 = vadd.f32 %v1187_v22, %v1186_v51  ;;  %v991_v34 = vadd.f32 %v990_v46, %v989_v28  ;;  %v1092_v51 = vmul.f32 %v2040_v10, %v2040_v10  ;;  %v1209_v46 = vsel %vm900_vm3, %v1091_v21, 0.0 }
 0x13a   :  { %v1016_v10 = vsel %vm900_vm3, %v2120_v15, 0.0 }
 0x13b   :  { %v1190_v31 = vadd.f32 %v1189_v48, %v1188_v25  ;;  %v993_v27 = vadd.f32 %v992_v54, %v991_v34  ;;  %v1211_v48 = vsel %vm900_vm3, %v1092_v51, 0.0  ;;  %v1094_v54 = vmul.f32 %v2120_v15, %v2120_v15 }
 0x13c   :  { %v1020_v15 = vsel %vm900_vm3, %v2190_v38, 0.0 }
 0x13d   :  { %v1192_v37 = vadd.f32 %v1191_v45, %v1190_v31  ;;  %v995_v57 = vadd.f32 %v994_v17, %v993_v27  ;;  %v1213_v27 = vsel %vm900_vm3, %v1093_v26, 0.0 }
 0x13f   :  { %v997_v40 = vadd.f32 %v996_v43, %v995_v57  ;;  %v1194_v24 = vadd.f32 %v1193_v41, %v1192_v37  ;;  %v1215_v37 = vsel %vm900_vm3, %v1094_v54, 0.0  ;;  %v1096_v57 = vmul.f32 %v2190_v38, %v2190_v38 }
 0x140   :  { %v1217_v41 = vsel %vm900_vm3, %v1095_v29, 0.0  ;;  %v1024_v38 = vsel %vm900_vm3, %v2246_v42, 0.0 }
 0x141   :  { %v999_v56 = vadd.f32 %v998_v52, %v997_v40  ;;  %v1196_v4 = vadd.f32 %v1195_v47, %v1194_v24  ;;  %v1097_v40 = vmul.f32 %v2214_v6, %v2214_v6  ;;  %v1219_v52 = vsel %vm900_vm3, %v1096_v57, 0.0 }
 0x142   :  { %v1026_v6 = vsel %vm900_vm3, %v2270_v5, 0.0 }
 0x143   :  { %v1001_v61 = vadd.f32 %v1000_v36, %v999_v56  ;;  %v1198_v49 = vadd.f32 %v1197_v2, %v1196_v4  ;;  %v1221_v2 = vsel %vm900_vm3, %v1097_v40, 0.0  ;;  %v1099_v36 = vmul.f32 %v2270_v5, %v2270_v5 }
 0x145   :  { %v1003_v62 = vadd.f32 %v1002_v44, %v1001_v61  ;;  %v1200_v7 = vadd.f32 %v1199_v55, %v1198_v49  ;;  %v1223_v49 = vsel %vm900_vm3, %v1098_v58, 0.0  ;;  %v1225_v59 = vsel %vm900_vm3, %v1099_v36, 0.0 }
 0x147   :  { %v1005_v18 = vadd.f32 %v1004_v53, %v1003_v62  ;;  %v1202_v3 = vadd.f32 %v1201_v1, %v1200_v7 }
 0x149   :  { %v1007_v23 = vadd.f32 %v1006_v63, %v1005_v18  ;;  %v1204_v13 = vadd.f32 %v1203_v19, %v1202_v3 }
 0x14b   :  { %v1206_v12 = vadd.f32 %v1205_v60, %v1204_v13  ;;  %v1009_v39 = vadd.f32 %v1008_v8, %v1007_v23 }
 0x14d   :  { %v1011_v28 = vadd.f32 %v1010_v20, %v1009_v39  ;;  %v1208_v22 = vadd.f32 %v1207_v50, %v1206_v12 }
 0x14f   :  { %v1013_v25 = vadd.f32 %v1012_v0, %v1011_v28  ;;  %v1210_v34 = vadd.f32 %v1209_v46, %v1208_v22 }
 0x151   :  { %v1015_v35 = vadd.f32 %v1014_v30, %v1013_v25  ;;  %v1212_v31 = vadd.f32 %v1211_v48, %v1210_v34 }
 0x153   :  { %v1017_v45 = vadd.f32 %v1016_v10, %v1015_v35  ;;  %v1214_v17 = vadd.f32 %v1213_v27, %v1212_v31 }
 0x155   :  { %v1019_v43 = vadd.f32 %v1018_v32, %v1017_v45  ;;  %v1216_v14 = vadd.f32 %v1215_v37, %v1214_v17 }
 0x157   :  { %v1218_v24 = vadd.f32 %v1217_v41, %v1216_v14  ;;  %v1021_v47 = vadd.f32 %v1020_v15, %v1019_v43 }
 0x159   :  { %v1220_v56 = vadd.f32 %v1219_v52, %v1218_v24  ;;  %v1023_v4 = vadd.f32 %v1022_v16, %v1021_v47 }
 0x15b   :  { %v1222_v33 = vadd.f32 %v1221_v2, %v1220_v56  ;;  %v1025_v61 = vadd.f32 %v1024_v38, %v1023_v4 }
 0x15d   :  { %v1224_v55 = vadd.f32 %v1223_v49, %v1222_v33  ;;  %v1027_v44 = vadd.f32 %v1026_v6, %v1025_v61 }
 0x15f   :  { %v1028_v62 = vrot.slane %v1027_v44, 4  ;;  %v1226_v7 = vadd.f32 %v1225_v59, %v1224_v55 }
 0x161   :  { %v1029_v1 = vadd.f32 %v1028_v62, %v1027_v44  ;;  %v1227_v53 = vrot.slane %v1226_v7, 4 }
 0x163   :  { %v1030_v11 = vrot.slane %v1029_v1, 2  ;;  %v1228_v42 = vadd.f32 %v1227_v53, %v1226_v7 }
 0x165   :  { %v1229_v18 = vrot.slane %v1228_v42, 2  ;;  %v1031_v3 = vadd.f32 %v1030_v11, %v1029_v1 }
 0x167   :  { %v1032_v19 = vrot.slane %v1031_v3, 1  ;;  %v1230_v5 = vadd.f32 %v1229_v18, %v1228_v42 }
 0x169   :  { %v1033_v63 = vadd.f32 %v1032_v19, %v1031_v3  ;;  %v1231_v9 = vrot.slane %v1230_v5, 1 }
 0x16b   :  { %1035 = vst.msk [vmem:[#allocation2] sm:$0x1] %vm1034_vm4, %v1033_v63  ;;  %v1232_v23 = vadd.f32 %v1231_v9, %v1230_v5 }
 0x16c   :  { %1246 = dma.vmem_to_hbm [thread:$0]  %s1242_s25, 16, %s1244_s28, [#allocation3]  }
 0x16d   :  { %1233 = vst.msk [vmem:[#allocation4] sm:$0x1] %vm1034_vm4, %v1232_v23 }
 0x16e   :  { %1257 = dma.vmem_to_hbm [thread:$0]  %s1253_s30, 16, %s1255_s0, [#allocation5]  }
 0x16f   :  { %1355 = dma.done.wait [#allocation3], 16  }
 0x170   :  { %1356 = vsyncadd [#allocation3], 4294967280 }
 0x171   :  { %1357 = dma.done.wait [#allocation5], 16  }
 0x172   :  { %1358 = vsyncadd [#allocation5], 4294967280 }
 0x173   :  { %1268 = vsyncpa [#allocation3], 1 }
 0x174   :  { %1269 = vsyncpa [#allocation5], 1 }

</bundles_post_ra>
